<compile_context>
chip_gen: v7x
topology: tpu7x:2x2x1
jax: 0.10.0
libtpu: 0.0.40
codegen_flags: <defaults>
</compile_context>

<pallas_src>
import jax
import jax.numpy as jnp
from jax.experimental import pallas as pl
from jax.experimental.pallas import tpu as pltpu


ROW_ALIGN = 16  # bf16 sublane packing -> keep row-tile counts multiples of 16


def _round_down(v, m):
    return max(m, (v // m) * m)


def _make_linkpred_kernel(num_layers, final_reduce):
    """Build a kernel body for a fixed number of linear layers."""

    def kernel(*refs):
        # refs = (xi_ref, xj_ref, w0, b0, w1, b1, ..., out_ref)
        xi_ref, xj_ref = refs[0], refs[1]
        out_ref = refs[-1]
        wb_refs = refs[2:-1]

        # Hadamard product of the two node embeddings.  Inputs stream as bf16;
        # elementwise math stays f32 (v5e has no bf16 VPU, and the kernel is
        # HBM-bound so the upcast is free slack).
        x = xi_ref[...].astype(jnp.float32) * xj_ref[...].astype(jnp.float32)

        # Hidden layers: MXU matmul + VPU bias add + relu.
        for layer in range(num_layers - 1):
            w = wb_refs[2 * layer][...]
            b = wb_refs[2 * layer + 1][...]          # (1, hidden) broadcasts over rows
            x = jnp.dot(x, w, preferred_element_type=jnp.float32) + b
            x = jnp.maximum(x, 0.0)
            # TODO(synk): dropout skipped (inference / training=False path).

        w_last = wb_refs[-2][...]
        b_last = wb_refs[-1][...]
        if final_reduce:
            # out_channels == 1: a (rows, H) @ (H, 1) matmul wastes a full MXU
            # pass for a 1-lane result.  Use VPU multiply + XLU lane reduce.
            o = jnp.sum(x * w_last, axis=-1, keepdims=True) + b_last
        else:
            o = jnp.dot(x, w_last, preferred_element_type=jnp.float32) + b_last
        out_ref[...] = jax.nn.sigmoid(o).astype(out_ref.dtype)

    return kernel


def link_predictor_pallas(x_i, x_j, weights, biases, *, block_rows=1024):
    """Fused LinkPredictor forward pass.

    x_i, x_j : (N, in_channels) float32 or bfloat16 node embeddings
    weights  : list of (in_dim, out_dim) float32  (already transposed vs PyTorch)
    biases   : list of (out_dim,) float32
    """
    N, in_ch = x_i.shape
    num_layers = len(weights)
    out_ch = weights[-1].shape[1]
    final_reduce = (out_ch == 1)

    # Stream node embeddings as bf16 (no-op if the caller already stores bf16).
    x_i = x_i.astype(jnp.bfloat16)
    x_j = x_j.astype(jnp.bfloat16)

    # Tile-size policy: as large as requested, but
    #   (a) a multiple of the bf16 sublane packing (16),
    #   (b) small enough that the grid has >= 2 steps whenever N allows it
    #       (keeps both v7x TensorCores busy and preserves pipelining slack).
    if N >= 2 * ROW_ALIGN:
        block_rows = min(block_rows, _round_down(pl.cdiv(N, 2), ROW_ALIGN))
    else:
        block_rows = ROW_ALIGN
    block_rows = max(ROW_ALIGN, _round_down(block_rows, ROW_ALIGN))

    # Pad rows so every grid step gets a full tile; tail rows are sliced off.
    grid_rows = pl.cdiv(N, block_rows)
    n_pad = grid_rows * block_rows
    if n_pad != N:
        pad = ((0, n_pad - N), (0, 0))
        x_i = jnp.pad(x_i, pad)
        x_j = jnp.pad(x_j, pad)

    kernel = _make_linkpred_kernel(num_layers, final_reduce)

    # Interleave weights/biases.  Constant index_maps -> parameters are DMA'd
    # once and stay VMEM-resident across all grid steps (total footprint ~8.5 KB).
    wb_args, wb_specs = [], []
    for idx, (w, b) in enumerate(zip(weights, biases)):
        if idx == num_layers - 1 and final_reduce:
            w_arg = w.astype(jnp.float32).reshape(1, -1)   # (hidden, 1) -> (1, hidden)
        else:
            w_arg = w.astype(jnp.float32)
        b_arg = b.astype(jnp.float32).reshape(1, -1)        # (1, out_dim) VMEM tile
        wb_args.extend([w_arg, b_arg])
        wb_specs.append(pl.BlockSpec(w_arg.shape, lambda i: (0, 0)))
        wb_specs.append(pl.BlockSpec(b_arg.shape, lambda i: (0, 0)))

    in_specs = [
        pl.BlockSpec((block_rows, in_ch), lambda i: (i, 0)),  # x_i tile
        pl.BlockSpec((block_rows, in_ch), lambda i: (i, 0)),  # x_j tile
    ] + wb_specs
    out_spec = pl.BlockSpec((block_rows, out_ch), lambda i: (i, 0))

    out = pl.pallas_call(
        kernel,
        out_shape=jax.ShapeDtypeStruct((n_pad, out_ch), jnp.float32),
        grid_spec=pltpu.PrefetchScalarGridSpec(
            num_scalar_prefetch=0,
            grid=(grid_rows,),
            in_specs=in_specs,
            out_specs=out_spec,
        ),
        compiler_params=pltpu.CompilerParams(
            dimension_semantics=("parallel",)),
    )(x_i, x_j, *wb_args)

    return out[:N]


def link_predictor_ref(x_i, x_j, weights, biases):
    """Pure-JAX reference mirroring the PyTorch forward (eval mode)."""
    x = x_i.astype(jnp.float32) * x_j.astype(jnp.float32)
    for w, b in zip(weights[:-1], biases[:-1]):
        x = jnp.maximum(x @ w + b, 0.0)
    x = x @ weights[-1] + biases[-1]
    return jax.nn.sigmoid(x)


if __name__ == "__main__":
    # Small shapes consistent with the module:
    #   in_channels=32, hidden_channels=32, out_channels=1, num_layers=3
    in_channels = 32
    hidden_channels = 32
    out_channels = 1
    num_layers = 3
    N = 128           # number of candidate edges (rows)

    key = jax.random.PRNGKey(0)
    k_xi, k_xj, k_w = jax.random.split(key, 3)

    # Node embeddings stored/streamed in bf16 (what the kernel reads from HBM).
    x_i = jax.random.normal(k_xi, (N, in_channels), jnp.float32).astype(jnp.bfloat16)
    x_j = jax.random.normal(k_xj, (N, in_channels), jnp.float32).astype(jnp.bfloat16)

    # Deterministic parameter init (shapes match torch.nn.Linear, stored as (in, out)).
    layer_dims = ([(in_channels, hidden_channels)] +
                  [(hidden_channels, hidden_channels)] * (num_layers - 2) +
                  [(hidden_channels, out_channels)])
    weights, biases = [], []
    for (d_in, d_out), wk in zip(layer_dims, jax.random.split(k_w, num_layers)):
        kw, kb = jax.random.split(wk)
        bound = 1.0 / (d_in ** 0.5)
        weights.append(jax.random.uniform(kw, (d_in, d_out), jnp.float32, -bound, bound))
        biases.append(jax.random.uniform(kb, (d_out,), jnp.float32, -bound, bound))

    out = link_predictor_pallas(x_i, x_j, weights, biases)
    out = jax.block_until_ready(out)

    # Reference sees the same bf16-rounded inputs the kernel streams; small
    # tolerance covers the TPU default-precision MXU path vs the exact f32 reduce.
    ref = link_predictor_ref(x_i, x_j, weights, biases)
    assert out.shape == (N, out_channels)
    assert jnp.allclose(out, ref, atol=1e-4, rtol=1e-4), "mismatch vs reference"

    print("KERNEL_OK")
</pallas_src>

<mosaic_0001>
module attributes {stable_mosaic.version = 11 : i64} {
  func.func @kernel(%arg0: i32, %arg1: memref<64x32xbf16, #tpu.memory_space<vmem>>, %arg2: memref<64x32xbf16, #tpu.memory_space<vmem>>, %arg3: memref<32x32xf32, #tpu.memory_space<vmem>>, %arg4: memref<1x32xf32, #tpu.memory_space<vmem>>, %arg5: memref<32x32xf32, #tpu.memory_space<vmem>>, %arg6: memref<1x32xf32, #tpu.memory_space<vmem>>, %arg7: memref<1x32xf32, #tpu.memory_space<vmem>>, %arg8: memref<1x1xf32, #tpu.memory_space<vmem>>, %arg9: memref<64x1xf32, #tpu.memory_space<vmem>>) attributes {dimension_semantics = [#tpu.dimension_semantics<parallel>], iteration_bounds = array<i64: 2>, scalar_prefetch = 0 : i64, scratch_operands = 0 : i64, tpu.core_type = #tpu.core_type<tc>, window_params = [{transform_indices = @transform_0, window_bounds = array<i64: 64, 32>}, {transform_indices = @transform_1, window_bounds = array<i64: 64, 32>}, {pipeline_mode = #tpu.pipeline_mode<synchronous>, transform_indices = @transform_2, window_bounds = array<i64: 32, 32>}, {pipeline_mode = #tpu.pipeline_mode<synchronous>, transform_indices = @transform_3, window_bounds = array<i64: 1, 32>}, {pipeline_mode = #tpu.pipeline_mode<synchronous>, transform_indices = @transform_4, window_bounds = array<i64: 32, 32>}, {pipeline_mode = #tpu.pipeline_mode<synchronous>, transform_indices = @transform_5, window_bounds = array<i64: 1, 32>}, {pipeline_mode = #tpu.pipeline_mode<synchronous>, transform_indices = @transform_6, window_bounds = array<i64: 1, 32>}, {pipeline_mode = #tpu.pipeline_mode<synchronous>, transform_indices = @transform_7, window_bounds = array<i64: 1, 1>}, {transform_indices = @transform_8, window_bounds = array<i64: 64, 1>}]} {
    %c0 = arith.constant 0 : index
    %c0_0 = arith.constant 0 : index
    %0 = vector.load %arg1[%c0, %c0_0] : memref<64x32xbf16, #tpu.memory_space<vmem>>, vector<64x32xbf16>
    %1 = arith.extf %0 : vector<64x32xbf16> to vector<64x32xf32>
    %c0_1 = arith.constant 0 : index
    %c0_2 = arith.constant 0 : index
    %2 = vector.load %arg2[%c0_1, %c0_2] : memref<64x32xbf16, #tpu.memory_space<vmem>>, vector<64x32xbf16>
    %3 = arith.extf %2 : vector<64x32xbf16> to vector<64x32xf32>
    %4 = arith.mulf %1, %3 : vector<64x32xf32>
    %c0_3 = arith.constant 0 : index
    %c0_4 = arith.constant 0 : index
    %5 = vector.load %arg3[%c0_3, %c0_4] : memref<32x32xf32, #tpu.memory_space<vmem>>, vector<32x32xf32>
    %c0_5 = arith.constant 0 : index
    %c0_6 = arith.constant 0 : index
    %6 = vector.load %arg4[%c0_5, %c0_6] : memref<1x32xf32, #tpu.memory_space<vmem>>, vector<1x32xf32>
    %cst = arith.constant dense<0.000000e+00> : vector<64x32xf32>
    %7 = tpu.matmul %4, %5, %cst {dimension_numbers = #tpu.dot_dimension_numbers<[1], [0], [0], [1], [0, 0, 1, 1], [], []>} : vector<64x32xf32>, vector<32x32xf32>, vector<64x32xf32> -> vector<64x32xf32>
    %8 = vector.broadcast %6 : vector<1x32xf32> to vector<64x32xf32>
    %9 = arith.addf %7, %8 : vector<64x32xf32>
    %cst_7 = arith.constant 0.000000e+00 : f32
    %10 = vector.broadcast %cst_7 : f32 to vector<64x32xf32>
    %11 = arith.maximumf %9, %10 : vector<64x32xf32>
    %c0_8 = arith.constant 0 : index
    %c0_9 = arith.constant 0 : index
    %12 = vector.load %arg5[%c0_8, %c0_9] : memref<32x32xf32, #tpu.memory_space<vmem>>, vector<32x32xf32>
    %c0_10 = arith.constant 0 : index
    %c0_11 = arith.constant 0 : index
    %13 = vector.load %arg6[%c0_10, %c0_11] : memref<1x32xf32, #tpu.memory_space<vmem>>, vector<1x32xf32>
    %cst_12 = arith.constant dense<0.000000e+00> : vector<64x32xf32>
    %14 = tpu.matmul %11, %12, %cst_12 {dimension_numbers = #tpu.dot_dimension_numbers<[1], [0], [0], [1], [0, 0, 1, 1], [], []>} : vector<64x32xf32>, vector<32x32xf32>, vector<64x32xf32> -> vector<64x32xf32>
    %15 = vector.broadcast %13 : vector<1x32xf32> to vector<64x32xf32>
    %16 = arith.addf %14, %15 : vector<64x32xf32>
    %cst_13 = arith.constant 0.000000e+00 : f32
    %17 = vector.broadcast %cst_13 : f32 to vector<64x32xf32>
    %18 = arith.maximumf %16, %17 : vector<64x32xf32>
    %c0_14 = arith.constant 0 : index
    %c0_15 = arith.constant 0 : index
    %19 = vector.load %arg7[%c0_14, %c0_15] : memref<1x32xf32, #tpu.memory_space<vmem>>, vector<1x32xf32>
    %c0_16 = arith.constant 0 : index
    %c0_17 = arith.constant 0 : index
    %20 = vector.load %arg8[%c0_16, %c0_17] : memref<1x1xf32, #tpu.memory_space<vmem>>, vector<1x1xf32>
    %21 = vector.broadcast %19 : vector<1x32xf32> to vector<64x32xf32>
    %22 = arith.mulf %18, %21 : vector<64x32xf32>
    %cst_18 = arith.constant dense<0.000000e+00> : vector<64xf32>
    %23 = vector.multi_reduction <add>, %22, %cst_18 [1] : vector<64x32xf32> to vector<64xf32>
    %24 = vector.shape_cast %23 : vector<64xf32> to vector<64x1xf32>
    %25 = vector.broadcast %20 : vector<1x1xf32> to vector<64x1xf32>
    %26 = arith.addf %24, %25 : vector<64x1xf32>
    %27 = arith.negf %26 : vector<64x1xf32>
    %28 = math.exp %27 : vector<64x1xf32>
    %cst_19 = arith.constant 1.000000e+00 : f32
    %29 = vector.broadcast %cst_19 : f32 to vector<64x1xf32>
    %30 = arith.addf %29, %28 : vector<64x1xf32>
    %31 = arith.divf %29, %30 : vector<64x1xf32>
    %c0_20 = arith.constant 0 : index
    %c0_21 = arith.constant 0 : index
    %32 = vector.load %arg9[%c0_20, %c0_21] : memref<64x1xf32, #tpu.memory_space<vmem>>, vector<64x1xf32>
    tpu.vector_store %arg9[%c0_20, %c0_21], %31 {strides = array<i32>} : memref<64x1xf32, #tpu.memory_space<vmem>>, vector<64x1xf32>,
    return
  }
  func.func @transform_0(%arg0: i32) -> (i32, i32) {
    %c0_i32 = arith.constant 0 : i32
    %c0_i32_0 = arith.constant 0 : i32
    return %arg0, %c0_i32 : i32, i32
  }
  func.func @transform_1(%arg0: i32) -> (i32, i32) {
    %c0_i32 = arith.constant 0 : i32
    %c0_i32_0 = arith.constant 0 : i32
    return %arg0, %c0_i32 : i32, i32
  }
  func.func @transform_2(%arg0: i32) -> (i32, i32) {
    %c0_i32 = arith.constant 0 : i32
    %c0_i32_0 = arith.constant 0 : i32
    %c0_i32_1 = arith.constant 0 : i32
    return %c0_i32, %c0_i32_0 : i32, i32
  }
  func.func @transform_3(%arg0: i32) -> (i32, i32) {
    %c0_i32 = arith.constant 0 : i32
    %c0_i32_0 = arith.constant 0 : i32
    %c0_i32_1 = arith.constant 0 : i32
    return %c0_i32, %c0_i32_0 : i32, i32
  }
  func.func @transform_4(%arg0: i32) -> (i32, i32) {
    %c0_i32 = arith.constant 0 : i32
    %c0_i32_0 = arith.constant 0 : i32
    %c0_i32_1 = arith.constant 0 : i32
    return %c0_i32, %c0_i32_0 : i32, i32
  }
  func.func @transform_5(%arg0: i32) -> (i32, i32) {
    %c0_i32 = arith.constant 0 : i32
    %c0_i32_0 = arith.constant 0 : i32
    %c0_i32_1 = arith.constant 0 : i32
    return %c0_i32, %c0_i32_0 : i32, i32
  }
  func.func @transform_6(%arg0: i32) -> (i32, i32) {
    %c0_i32 = arith.constant 0 : i32
    %c0_i32_0 = arith.constant 0 : i32
    %c0_i32_1 = arith.constant 0 : i32
    return %c0_i32, %c0_i32_0 : i32, i32
  }
  func.func @transform_7(%arg0: i32) -> (i32, i32) {
    %c0_i32 = arith.constant 0 : i32
    %c0_i32_0 = arith.constant 0 : i32
    %c0_i32_1 = arith.constant 0 : i32
    return %c0_i32, %c0_i32_0 : i32, i32
  }
  func.func @transform_8(%arg0: i32) -> (i32, i32) {
    %c0_i32 = arith.constant 0 : i32
    %c0_i32_0 = arith.constant 0 : i32
    return %arg0, %c0_i32 : i32, i32
  }
}

</mosaic_0001>

<bundles_post_ra>
// kernel: tpu_custom_call.1
= control target key start
LH: loop header
LB: loop body
LE: loop exit
PB: predicated region body
PF: predicated region fallthrough
CT: control target
= control target key end

     0   :  { %s1104_s29 = smov 0   ;;  %s1193_s0 = inlined_call_operand.vmem [shape: bf16[128,32], index: 0, kind: input, shape index: {}]   ;;  %s1194_s1 = inlined_call_operand.vmem [shape: bf16[128,32], index: 1, kind: input, shape index: {}]   ;;  %s1195_s2 = inlined_call_operand.vmem [shape: f32[32,32], index: 2, kind: input, shape index: {}]   ;;  %s1196_s3 = inlined_call_operand.vmem [shape: f32[1,32], index: 3, kind: input, shape index: {}]   ;;  %s1197_s4 = inlined_call_operand.vmem [shape: f32[32,32], index: 4, kind: input, shape index: {}]   ;;  %s1198_s5 = inlined_call_operand.vmem [shape: f32[1,32], index: 5, kind: input, shape index: {}]   ;;  %s1199_s6 = inlined_call_operand.vmem [shape: f32[1,32], index: 6, kind: input, shape index: {}]   ;;  %s1200_s7 = inlined_call_operand.<no memory space> [shape: f32[1,1], index: 7, kind: input, shape index: {}]   ;;  %s1201_s8 = inlined_call_operand.vmem [shape: f32[128,1], index: 8, kind: output, shape index: {}]  }
   0x1   :  { %v13_v0 = vstv %s1200_s7 }
   0x2   :  { %14 = vst [vmem:[#allocation2] sm:$0x1] %v13_v0 }
   0x3 LB: > { %s849_s30 = sadd.s32 4294967295, %s1054_s29   ;;  %p853_p0 = scmp.ge.s32.totalorder %s1054_s29, 1  ;;  %s1054_s29 = sphi %s1104_s29, %s20_s29  }
   0x4   : > { %p276_p1 = scmp.lt.s32.totalorder %s1054_s29, 3 }
   0x6   : > { %p277_p2 = pnand %p853_p0, %p276_p1 }
   0x7   : > { %v373_v1 = vld [vmem:[%s1195_s2] sm:$0xff] (!%p277_p2)  ;;  %v374_v2 = vld [vmem:[%s1195_s2 + $0x8] sm:$0xff] (!%p277_p2)  ;;  %v375_v3 = vld [vmem:[%s1195_s2 + $0x10] sm:$0xff] (!%p277_p2)  ;;  %s854_s14 = sshll.u32 (!%p277_p2), %s849_s30, 3  ;;  %vm384_vm0 = vcmask (!%p277_p2), 261120   ;;  %vm772_vm1 = vcmask (!%p277_p2), 7168  }
   0x8   : > { %280 = sbr.rel (%p277_p2) target bundleno = 649 (0x289), region = 52  ;;  %v992_v4 = vpack.c.bf16 (!%p277_p2), %v374_v2, %v373_v1  ;;  %v376_v5 = vld [vmem:[%s1195_s2 + $0x18] sm:$0xff] (!%p277_p2)  ;;  %p316_p3 = scmp.lt.s32.totalorder (!%p277_p2), %s854_s14, 15  ;;  %v522_v6 = vld [vmem:[%s1197_s4] sm:$0xff] (!%p277_p2)  ;;  %v523_v7 = vld [vmem:[%s1197_s4 + $0x8] sm:$0xff] (!%p277_p2) }
   0x9   : > { %v996_v8 = vpack.c.bf16 (!%p277_p2), %v376_v5, %v375_v3  ;;  %v1000_v9 = vpack.c.bf16 (!%p277_p2), %v523_v7, %v522_v6  ;;  %v524_v42 = vld [vmem:[%s1197_s4 + $0x10] sm:$0xff] (!%p277_p2)  ;;  %v525_v43 = vld [vmem:[%s1197_s4 + $0x18] sm:$0xff] (!%p277_p2)  ;;  %v860_v45 = vld [vmem:[%s1196_s3] ss:$0 sm:$0xff] (!%p277_p2) }
   0xa   : > { %993 = vmatprep.subr.bf16.mxu0 (!%p277_p2), %v992_v4  ;;  %v1004_v44 = vpack.c.bf16 (!%p277_p2), %v525_v43, %v524_v42  ;;  %v869_v6 = vld [vmem:[%s1198_s5] ss:$0 sm:$0xff] (!%p277_p2) }
   0xb   : > { %995 = vmatpush3.bf16.msra.mxu0 (!%p277_p2), %v992_v4  ;;  %1001 = vmatprep.subr.bf16.mxu1 (!%p277_p2), %v1000_v9 }
   0xc   : > { %997 = vmatprep.subr.bf16.mxu0 (!%p277_p2), %v996_v8  ;;  %1003 = vmatpush3.bf16.msra.mxu1 (!%p277_p2), %v1000_v9 }
   0xd   : > { %1005 = vmatprep.subr.bf16.mxu1 (!%p277_p2), %v1004_v44 }
   0xf   : > { %s1203_s14 = smov (!%p316_p3, %s854_s14), 15  ;;  %999 = vmatpush3.bf16.msra.mxu0 %v996_v8 }
  0x10   : > { %s855_s21 = sshll.u32 %s1203_s14, 2  ;;  %1007 = vmatpush3.bf16.msra.mxu1 %v1004_v44  ;;  %s859_s17 = sshll.u32 %s1203_s14, 3 }
  0x11   : > { %s319_s24 = scalar_lea.vmem %s1193_s0, %s855_s21  ;;  %s325_s27 = scalar_lea.vmem %s1194_s1, %s855_s21 }
  0x12   : > { %v891_v10 = vld [vmem:[%s319_s24] sm:$0xff]   ;;  %v922_v12 = vld [vmem:[%s319_s24 + $0x8] sm:$0xff]   ;;  %v923_v18 = vld [vmem:[%s319_s24 + $0x10] sm:$0xff]   ;;  %s331_s20 = scalar_lea.vmem %s1201_s8, %s859_s17 }
  0x13   : > { %v907_v11 = vld [vmem:[%s325_s27] sm:$0xff]   ;;  %v892_v13 = vunpack.c.l.bf16 %v891_v10  ;;  %v893_v14 = vunpack.c.h.bf16 %v891_v10  ;;  %v925_v17 = vld [vmem:[%s325_s27 + $0x8] sm:$0xff]   ;;  %v926_v19 = vld [vmem:[%s325_s27 + $0x10] sm:$0xff]   ;;  %v896_v20 = vunpack.c.l.bf16 %v922_v12  ;;  %v897_v22 = vunpack.c.h.bf16 %v922_v12 }
  0x14   : > { %v908_v15 = vunpack.c.l.bf16 %v907_v11  ;;  %v909_v16 = vunpack.c.h.bf16 %v907_v11  ;;  %v912_v21 = vunpack.c.l.bf16 %v925_v17  ;;  %v913_v23 = vunpack.c.h.bf16 %v925_v17  ;;  %v924_v29 = vld [vmem:[%s319_s24 + $0x18] sm:$0xff]   ;;  %v878_v11 = vld [vmem:[%s1199_s6] ss:$0 sm:$0xff] }
  0x15   : > { %v900_v26 = vunpack.c.l.bf16 %v923_v18  ;;  %v916_v27 = vunpack.c.l.bf16 %v926_v19  ;;  %v927_v30 = vld [vmem:[%s325_s27 + $0x18] sm:$0xff]   ;;  %v901_v32 = vunpack.c.h.bf16 %v923_v18  ;;  %v917_v33 = vunpack.c.h.bf16 %v926_v19 }
  0x16   : > { %v365_v24 = vmul.f32 %v908_v15, %v892_v13  ;;  %v366_v25 = vmul.f32 %v909_v16, %v893_v14  ;;  %v367_v28 = vmul.f32 %v912_v21, %v896_v20  ;;  %v368_v31 = vmul.f32 %v913_v23, %v897_v22 }
  0x17   : > { %v369_v34 = vmul.f32 %v916_v27, %v900_v26  ;;  %v904_v35 = vunpack.c.l.bf16 %v924_v29  ;;  %v920_v36 = vunpack.c.l.bf16 %v927_v30  ;;  %v370_v37 = vmul.f32 %v917_v33, %v901_v32 }
  0x18   : > { %960 = vmatprep.mubr.msk.f32.mxu0 %vm384_vm0, %v365_v24  ;;  %v905_v38 = vunpack.c.h.bf16 %v924_v29  ;;  %v921_v39 = vunpack.c.h.bf16 %v927_v30 }
  0x19   : > { %961 = vmatmul.mubr.msk.f32.vlgmr.msra.gmra.mrb[0].mxu0 %vm384_vm0, %v366_v25  ;;  %v371_v40 = vmul.f32 %v920_v36, %v904_v35 }
  0x1a   : > { %963 = vmatprep.mubr.msk.f32.mxu0 %vm384_vm0, %v367_v28  ;;  %v372_v41 = vmul.f32 %v921_v39, %v905_v38 }
  0x1d   : > { %964 = vmatmul.mubr.msk.f32.gmra.mrb[2].mxu0 %vm384_vm0, %v368_v31 }
  0x1e   : > { %966 = vmatprep.mubr.msk.f32.mxu0 %vm384_vm0, %v369_v34 }
  0x21   : > { %967 = vmatmul.mubr.msk.f32.gmra.mrb[4].mxu0 %vm384_vm0, %v370_v37 }
  0x22   : > { %969 = vmatprep.mubr.msk.f32.mxu0 %vm384_vm0, %v371_v40 }
  0x25   : > { %970 = vmatmul.mubr.msk.f32.gmra.mrb[6].mxu0 %vm384_vm0, %v372_v41 }
  0xec   : > { %v962_v46 = vpop.f32.mrb[0].mxu0 }
  0xed   : > { %v481_v47 = vadd.f32 %v962_v46, %v860_v45  ;;  %v475_v48 = vpop.f32.mrb[1].mxu0 }
  0xee   : > { %v476_v49 = vadd.f32 %v860_v45, %v475_v48  ;;  %v879_v48 = vld [vmem:[#allocation2] ss:$0 sm:$0xff] }
  0xef   : > { %v515_v52 = vmax.f32 %v481_v47, 0.0 }
  0xf0   : > { %v514_v50 = vmax.f32 %v476_v49, 0.0  ;;  %v965_v51 = vpop.f32.mrb[2].mxu0 }
  0xf1   : > { %v491_v53 = vadd.f32 %v965_v51, %v860_v45  ;;  %v485_v54 = vpop.f32.mrb[3].mxu0 }
  0xf2   : > { %v486_v55 = vadd.f32 %v860_v45, %v485_v54  ;;  %980 = vmatprep.mubr.msk.f32.mxu1 %vm384_vm0, %v514_v50 }
  0xf3   : > { %981 = vmatmul.mubr.msk.f32.vlgmr.msra.gmra.mrb[0].mxu1 %vm384_vm0, %v515_v52  ;;  %v517_v58 = vmax.f32 %v491_v53, 0.0 }
  0xf4   : > { %v516_v56 = vmax.f32 %v486_v55, 0.0  ;;  %v968_v57 = vpop.f32.mrb[4].mxu0 }
  0xf5   : > { %v501_v59 = vadd.f32 %v968_v57, %v860_v45  ;;  %v495_v60 = vpop.f32.mrb[5].mxu0 }
  0xf6   : > { %v496_v61 = vadd.f32 %v860_v45, %v495_v60  ;;  %983 = vmatprep.mubr.msk.f32.mxu1 %vm384_vm0, %v516_v56 }
  0xf7   : > { %v519_v62 = vmax.f32 %v501_v59, 0.0  ;;  %984 = vmatmul.mubr.msk.f32.gmra.mrb[2].mxu1 %vm384_vm0, %v517_v58 }
  0xf8   : > { %v518_v63 = vmax.f32 %v496_v61, 0.0  ;;  %v971_v0 = vpop.f32.mrb[6].mxu0 }
  0xf9   : > { %v511_v1 = vadd.f32 %v971_v0, %v860_v45  ;;  %v505_v2 = vpop.f32.mrb[7].mxu0 }
  0xfa   : > { %v506_v3 = vadd.f32 %v860_v45, %v505_v2  ;;  %986 = vmatprep.mubr.msk.f32.mxu1 %vm384_vm0, %v518_v63 }
  0xfb   : > { %v521_v4 = vmax.f32 %v511_v1, 0.0  ;;  %987 = vmatmul.mubr.msk.f32.gmra.mrb[4].mxu1 %vm384_vm0, %v519_v62 }
  0xfc   : > { %v520_v5 = vmax.f32 %v506_v3, 0.0 }
  0xfe   : > { %989 = vmatprep.mubr.msk.f32.mxu1 %vm384_vm0, %v520_v5 }
  0xff   : > { %990 = vmatmul.mubr.msk.f32.gmra.mrb[6].mxu1 %vm384_vm0, %v521_v4 }
 0x1c6   : > { %v982_v7 = vpop.f32.mrb[0].mxu1 }
 0x1c7   : > { %v629_v8 = vadd.f32 %v982_v7, %v869_v6  ;;  %v623_v9 = vpop.f32.mrb[1].mxu1 }
 0x1c8   : > { %v624_v10 = vadd.f32 %v869_v6, %v623_v9 }
 0x1c9   : > { %v663_v12 = vmax.f32 %v629_v8, 0.0 }
 0x1ca   : > { %v662_v13 = vmax.f32 %v624_v10, 0.0  ;;  %v985_v14 = vpop.f32.mrb[2].mxu1 }
 0x1cb   : > { %v639_v15 = vadd.f32 %v985_v14, %v869_v6  ;;  %v633_v16 = vpop.f32.mrb[3].mxu1  ;;  %v679_v17 = vmul.f32 %v878_v11, %v663_v12 }
 0x1cc   : > { %v634_v18 = vadd.f32 %v869_v6, %v633_v16  ;;  %v678_v21 = vmul.f32 %v878_v11, %v662_v13 }
 0x1cd   : > { %v665_v19 = vmax.f32 %v639_v15, 0.0  ;;  %v689_v20 = vsel %vm384_vm0, %v679_v17, 0.0 }
 0x1ce   : > { %v664_v22 = vmax.f32 %v634_v18, 0.0  ;;  %690 = vadd.xlane.f32.xlu0 %v689_v20  ;;  %v988_v23 = vpop.f32.mrb[4].mxu1  ;;  %v686_v30 = vsel %vm384_vm0, %v678_v21, 0.0 }
 0x1cf   : > { %v649_v24 = vadd.f32 %v988_v23, %v869_v6  ;;  %v643_v25 = vpop.f32.mrb[5].mxu1  ;;  %v681_v26 = vmul.f32 %v878_v11, %v665_v19 }
 0x1d0   : > { %v644_v27 = vadd.f32 %v869_v6, %v643_v25  ;;  %v680_v31 = vmul.f32 %v878_v11, %v664_v22 }
 0x1d1   : > { %v667_v28 = vmax.f32 %v649_v24, 0.0  ;;  %v695_v29 = vsel %vm384_vm0, %v681_v26, 0.0 }
 0x1d2   : > { %v666_v32 = vmax.f32 %v644_v27, 0.0  ;;  %696 = vadd.xlane.f32.xlu1 %v695_v29  ;;  %v991_v33 = vpop.f32.mrb[6].mxu1  ;;  %687 = vadd.xlane.f32.xlu0 %v686_v30  ;;  %v692_v39 = vsel %vm384_vm0, %v680_v31, 0.0 }
 0x1d3   : > { %v659_v34 = vadd.f32 %v991_v33, %v869_v6  ;;  %v653_v35 = vpop.f32.mrb[7].mxu1  ;;  %v683_v40 = vmul.f32 %v878_v11, %v667_v28 }
 0x1d4   : > { %v654_v36 = vadd.f32 %v869_v6, %v653_v35  ;;  %v682_v37 = vmul.f32 %v878_v11, %v666_v32 }
 0x1d5   : > { %v669_v38 = vmax.f32 %v659_v34, 0.0  ;;  %v701_v44 = vsel %vm384_vm0, %v683_v40, 0.0 }
 0x1d6   : > { %v668_v41 = vmax.f32 %v654_v36, 0.0  ;;  %693 = vadd.xlane.f32.xlu1 %v692_v39  ;;  %v698_v42 = vsel %vm384_vm0, %v682_v37, 0.0 }
 0x1d7   : > { %699 = vadd.xlane.f32.xlu0 %v698_v42  ;;  %v685_v45 = vmul.f32 %v878_v11, %v669_v38 }
 0x1d8   : > { %v684_v43 = vmul.f32 %v878_v11, %v668_v41 }
 0x1d9   : > { %v707_v47 = vsel %vm384_vm0, %v685_v45, 0.0 }
 0x1da   : > { %702 = vadd.xlane.f32.xlu1 %v701_v44  ;;  %v704_v46 = vsel %vm384_vm0, %v684_v43, 0.0 }
 0x1db   : > { %705 = vadd.xlane.f32.xlu0 %v704_v46 }
 0x1de   : > { %708 = vadd.xlane.f32.xlu1 %v707_v47 }
 0x25b   : > { %v691_v49 = vpop.xlane.xlu0 %690 }
 0x25c   : > { %v717_v50 = vadd.f32 %v879_v48, %v691_v49 }
 0x25e   : > { %v881_v51 = vmul.f32 -1.442695, %v717_v50 }
 0x25f   : > { %v697_v52 = vpop.xlane.xlu1 %696  ;;  %v688_v53 = vpop.xlane.xlu0 %687 }
 0x260   : > { %1016 = vpow2.f32 %v881_v51  ;;  %v719_v54 = vadd.f32 %v879_v48, %v697_v52  ;;  %v716_v55 = vadd.f32 %v879_v48, %v688_v53 }
 0x262   : > { %v883_v56 = vmul.f32 -1.442695, %v719_v54  ;;  %v880_v57 = vmul.f32 -1.442695, %v716_v55 }
 0x263   : > { %v694_v58 = vpop.xlane.xlu1 %693 }
 0x264   : > { %1018 = vpow2.f32 %v883_v56  ;;  %v718_v59 = vadd.f32 %v879_v48, %v694_v58  ;;  %v700_v60 = vpop.xlane.xlu0 %699 }
 0x265   : > { %1020 = vpow2.f32 %v880_v57  ;;  %v720_v61 = vadd.f32 %v879_v48, %v700_v60 }
 0x266   : > { %v882_v62 = vmul.f32 -1.442695, %v718_v59 }
 0x267   : > { %v884_v63 = vmul.f32 -1.442695, %v720_v61  ;;  %v703_v0 = vpop.xlane.xlu1 %702 }
 0x268   : > { %1022 = vpow2.f32 %v882_v62  ;;  %v721_v1 = vadd.f32 %v879_v48, %v703_v0  ;;  %v706_v2 = vpop.xlane.xlu0 %705 }
 0x269   : > { %1024 = vpow2.f32 %v884_v63  ;;  %v722_v3 = vadd.f32 %v879_v48, %v706_v2 }
 0x26a   : > { %v1017_v4 = vpop.eup %1016  ;;  %v885_v5 = vmul.f32 -1.442695, %v721_v1 }
 0x26b   : > { %v749_v6 = vadd.f32 1.0, %v1017_v4  ;;  %v886_v7 = vmul.f32 -1.442695, %v722_v3  ;;  %v709_v8 = vpop.xlane.xlu1 %708 }
 0x26c   : > { %1026 = vpow2.f32 %v885_v5  ;;  %v723_v9 = vadd.f32 %v879_v48, %v709_v8 }
 0x26d   : > { %1028 = vrcp.f32 %v749_v6 }
 0x26e   : > { %v1019_v10 = vpop.eup %1018  ;;  %1030 = vpow2.f32 %v886_v7  ;;  %v887_v11 = vmul.f32 -1.442695, %v723_v9 }
 0x26f   : > { %v1021_v12 = vpop.eup %1020  ;;  %v751_v13 = vadd.f32 1.0, %v1019_v10 }
 0x270   : > { %v748_v14 = vadd.f32 1.0, %v1021_v12  ;;  %1032 = vpow2.f32 %v887_v11 }
 0x271   : > { %1034 = vrcp.f32 %v751_v13 }
 0x272   : > { %v1023_v15 = vpop.eup %1022  ;;  %1036 = vrcp.f32 %v748_v14 }
 0x273   : > { %v1025_v16 = vpop.eup %1024  ;;  %v750_v17 = vadd.f32 1.0, %v1023_v15 }
 0x274   : > { %v752_v18 = vadd.f32 1.0, %v1025_v16 }
 0x275   : > { %1038 = vrcp.f32 %v750_v17 }
 0x276   : > { %v1027_v19 = vpop.eup %1026  ;;  %1040 = vrcp.f32 %v752_v18 }
 0x277   : > { %v1029_v20 = vpop.eup %1028  ;;  %v753_v21 = vadd.f32 1.0, %v1027_v19 }
 0x278   : > { %v1031_v22 = vpop.eup %1030  ;;  %774 = vst.msk [vmem:[%s331_s20 + $0x8] sm:$0xff] %vm772_vm1, %v1029_v20 }
 0x279   : > { %1042 = vrcp.f32 %v753_v21  ;;  %v754_v23 = vadd.f32 1.0, %v1031_v22 }
 0x27a   : > { %v1033_v24 = vpop.eup %1032 }
 0x27b   : > { %v1035_v25 = vpop.eup %1034  ;;  %1044 = vrcp.f32 %v754_v23  ;;  %v755_v26 = vadd.f32 1.0, %v1033_v24 }
 0x27c   : > { %v1037_v27 = vpop.eup %1036  ;;  %776 = vst.msk [vmem:[%s331_s20 + $0x18] sm:$0xff] %vm772_vm1, %v1035_v25 }
 0x27d   : > { %773 = vst.msk [vmem:[%s331_s20] sm:$0xff] %vm772_vm1, %v1037_v27  ;;  %1046 = vrcp.f32 %v755_v26 }
 0x27f   : > { %v1039_v28 = vpop.eup %1038 }
 0x280   : > { %v1041_v29 = vpop.eup %1040  ;;  %775 = vst.msk [vmem:[%s331_s20 + $0x10] sm:$0xff] %vm772_vm1, %v1039_v28 }
 0x281   : > { %777 = vst.msk [vmem:[%s331_s20 + $0x20] sm:$0xff] %vm772_vm1, %v1041_v29 }
 0x283   : > { %v1043_v30 = vpop.eup %1042 }
 0x284   : > { %778 = vst.msk [vmem:[%s331_s20 + $0x28] sm:$0xff] %vm772_vm1, %v1043_v30 }
 0x285   : > { %v1045_v31 = vpop.eup %1044 }
 0x286   : > { %779 = vst.msk [vmem:[%s331_s20 + $0x30] sm:$0xff] %vm772_vm1, %v1045_v31 }
 0x287   : > { %v1047_v32 = vpop.eup %1046 }
 0x288   : > { %780 = vst.msk [vmem:[%s331_s20 + $0x38] sm:$0xff] %vm772_vm1, %v1047_v32 }
 0x289 PF: > { %s20_s29 = sadd.s32 1, %s1054_s29  }
 0x28a   : > { %p17_p4 = scmp.ge.s32.totalorder %s20_s29, 4  }
 0x28c   :  { %19 = sbr.rel (!%p17_p4) target bundleno = 3 (0x3), region = 85 }

</bundles_post_ra>
